<compile_context>
chip_gen: v5e
topology: v5e:2x2
jax: 0.10.0
libtpu: 0.0.40
codegen_flags: <defaults>
</compile_context>

<pallas_src>
import jax
import jax.numpy as jnp
from jax.experimental import pallas as pl
from jax.experimental.pallas import tpu as pltpu

# Small synthetic config (consistent with SiglipConfig semantics).
BATCH = 2
CHANNELS = 3
IMAGE = 16
PATCH = 4
HIDDEN = 128                              # multiple of 128 -> lane-dense stores
NUM_PATCHES = (IMAGE // PATCH) ** 2       # 16
PATCH_DIM = CHANNELS * PATCH * PATCH      # 48


def siglip_embed_kernel(x_ref, w_ref, b_ref, pos_ref, o_ref):
    """x_ref: (B, Tn, K) f32 patches | w_ref: (K, H) bf16 | b_ref: (1, H) f32
    pos_ref: (Tn, H) f32 | o_ref: (B, Tn, H) f32."""
    w = w_ref[...]                        # (K, H) bf16, resident in VMEM
    bias = b_ref[...]                     # (1, H)  f32
    pos = pos_ref[...]                    # (Tn, H) f32
    nb = x_ref.shape[0]                   # static batch count within the block
    # Static unroll over the (tiny) leading batch dim: leading-axis indexing is
    # free (no XLU cross-lane traffic) and each matmul is a clean 2-D MXU push.
    for b in range(nb):
        xb = x_ref[b].astype(w.dtype)                              # (Tn, K) bf16
        yb = jnp.dot(xb, w, preferred_element_type=jnp.float32)    # f32 accum
        o_ref[b] = (yb + bias + pos).astype(o_ref.dtype)


def siglip_embedding(x, params, *, patch_size=PATCH, tile_np=None):
    """x: (B, C, H_img, W_img) f32 -> (B, num_patches, hidden) f32."""
    B, C, Himg, Wimg = x.shape
    P = patch_size
    Hn, Wn = Himg // P, Wimg // P
    Np = Hn * Wn
    Hd = params["w_patch"].shape[0]
    K = C * P * P

    # --- im2col for the stride==kernel conv (layout plumbing, zero FLOPs) ---
    # (B, C, Himg, Wimg) -> (B, Np, C*P*P) with (c, ph, pw) ordering matching the
    # PyTorch Conv2d weight layout (out, in, kh, kw).
    patches = x.reshape(B, C, Hn, P, Wn, P)
    patches = patches.transpose(0, 2, 4, 1, 3, 5).reshape(B, Np, K)

    # Conv weight -> (K, Hd) so the kernel computes patches @ W (+ bias).
    # Weights are stored / DMA'd as bf16 (perf review): halves weight traffic;
    # accumulation stays f32 inside the kernel.
    w = params["w_patch"].reshape(Hd, K).T.astype(jnp.bfloat16)
    b = params["b_patch"].reshape(1, Hd).astype(jnp.float32)
    pos = params["pos_emb"].astype(jnp.float32)                    # (Np, Hd)

    if tile_np is None:
        tile_np = Np                      # single grid step at these small shapes
    assert Np % tile_np == 0, "tile_np must divide num_patches"
    grid = (Np // tile_np,)

    return pl.pallas_call(
        siglip_embed_kernel,
        out_shape=jax.ShapeDtypeStruct((B, Np, Hd), x.dtype),
        grid_spec=pltpu.PrefetchScalarGridSpec(
            num_scalar_prefetch=0,
            grid=grid,
            in_specs=[
                pl.BlockSpec((B, tile_np, K), lambda j: (0, j, 0)),
                # Weight / bias blocks have constant index maps: fetched once.
                pl.BlockSpec((K, Hd), lambda j: (0, 0)),
                pl.BlockSpec((1, Hd), lambda j: (0, 0)),
                pl.BlockSpec((tile_np, Hd), lambda j: (j, 0)),
            ],
            out_specs=pl.BlockSpec((B, tile_np, Hd), lambda j: (0, j, 0)),
        ),
        compiler_params=pltpu.CompilerParams(
            # Patch-tile axis is independent work -> megacore-shardable on v7x.
            dimension_semantics=("parallel",),
            # Explicit VMEM budget (perf review): trivially satisfied here, but
            # keeps the same wrapper safe on v7x's 64 MiB VMEM at real sizes.
            vmem_limit_bytes=32 * 1024 * 1024,
        ),
    )(patches, w, b, pos)


def init_params(key, hidden=HIDDEN, channels=CHANNELS, patch=PATCH,
                num_pos=NUM_PATCHES):
    k0, k1, k2 = jax.random.split(key, 3)
    return {
        # PyTorch Conv2d weight layout: (out_channels, in_channels, kH, kW).
        "w_patch": 0.02 * jax.random.normal(
            k0, (hidden, channels, patch, patch), jnp.float32),
        "b_patch": 0.02 * jax.random.normal(k1, (hidden,), jnp.float32),
        # nn.Embedding(num_pos, hidden) indexed by arange == the full table.
        "pos_emb": 0.02 * jax.random.normal(k2, (num_pos, hidden), jnp.float32),
    }


def _reference(x, params, patch=PATCH):
    # Independent pure-JAX f32 reference matching the PyTorch forward exactly.
    y = jax.lax.conv_general_dilated(
        x, params["w_patch"], window_strides=(patch, patch), padding="VALID",
        dimension_numbers=("NCHW", "OIHW", "NCHW"))       # (B, Hd, Hn, Wn)
    B, Hd, Hn, Wn = y.shape
    y = y.reshape(B, Hd, Hn * Wn).transpose(0, 2, 1)      # flatten(2).transpose(1,2)
    return y + params["b_patch"][None, None, :] + params["pos_emb"][None]


if __name__ == "__main__":
    key = jax.random.PRNGKey(0)
    kx, kp = jax.random.split(key)
    x = jax.random.normal(kx, (BATCH, CHANNELS, IMAGE, IMAGE), dtype=jnp.float32)
    params = init_params(kp)

    y = siglip_embedding(x, params)
    jax.block_until_ready(y)

    assert y.shape == (BATCH, NUM_PATCHES, HIDDEN) and y.dtype == jnp.float32
    ref = _reference(x, params)
    # bf16 MXU operands (f32 accumulation) vs exact f32 conv reference.
    err = float(jnp.max(jnp.abs(y - ref)))
    assert jnp.allclose(y, ref, atol=1e-2, rtol=1e-2), f"max abs err {err}"
    print("KERNEL_OK")
</pallas_src>

<mosaic_0001>
module attributes {stable_mosaic.version = 11 : i64} {
  func.func @siglip_embed_kernel(%arg0: i32, %arg1: memref<2x16x48xf32, #tpu.memory_space<vmem>>, %arg2: memref<48x128xbf16, #tpu.memory_space<vmem>>, %arg3: memref<1x128xf32, #tpu.memory_space<vmem>>, %arg4: memref<16x128xf32, #tpu.memory_space<vmem>>, %arg5: memref<2x16x128xf32, #tpu.memory_space<vmem>>) attributes {dimension_semantics = [#tpu.dimension_semantics<parallel>], iteration_bounds = array<i64: 1>, scalar_prefetch = 0 : i64, scratch_operands = 0 : i64, tpu.core_type = #tpu.core_type<tc>, window_params = [{transform_indices = @transform_0, window_bounds = array<i64: 2, 16, 48>}, {pipeline_mode = #tpu.pipeline_mode<synchronous>, transform_indices = @transform_1, window_bounds = array<i64: 48, 128>}, {pipeline_mode = #tpu.pipeline_mode<synchronous>, transform_indices = @transform_2, window_bounds = array<i64: 1, 128>}, {transform_indices = @transform_3, window_bounds = array<i64: 16, 128>}, {transform_indices = @transform_4, window_bounds = array<i64: 2, 16, 128>}]} {
    %c0 = arith.constant 0 : index
    %c0_0 = arith.constant 0 : index
    %0 = vector.load %arg2[%c0, %c0_0] : memref<48x128xbf16, #tpu.memory_space<vmem>>, vector<48x128xbf16>
    %c0_1 = arith.constant 0 : index
    %c0_2 = arith.constant 0 : index
    %1 = vector.load %arg3[%c0_1, %c0_2] : memref<1x128xf32, #tpu.memory_space<vmem>>, vector<1x128xf32>
    %c0_3 = arith.constant 0 : index
    %c0_4 = arith.constant 0 : index
    %2 = vector.load %arg4[%c0_3, %c0_4] : memref<16x128xf32, #tpu.memory_space<vmem>>, vector<16x128xf32>
    %c0_5 = arith.constant 0 : index
    %c0_6 = arith.constant 0 : index
    %c0_7 = arith.constant 0 : index
    %3 = vector.load %arg1[%c0_5, %c0_6, %c0_7] : memref<2x16x48xf32, #tpu.memory_space<vmem>>, vector<1x16x48xf32>
    %4 = vector.shape_cast %3 : vector<1x16x48xf32> to vector<16x48xf32>
    %5 = arith.truncf %4 : vector<16x48xf32> to vector<16x48xbf16>
    %cst = arith.constant dense<0.000000e+00> : vector<16x128xf32>
    %6 = tpu.matmul %5, %0, %cst {dimension_numbers = #tpu.dot_dimension_numbers<[1], [0], [0], [1], [0, 0, 1, 1], [], []>} : vector<16x48xbf16>, vector<48x128xbf16>, vector<16x128xf32> -> vector<16x128xf32>
    %7 = vector.broadcast %1 : vector<1x128xf32> to vector<16x128xf32>
    %8 = arith.addf %6, %7 : vector<16x128xf32>
    %9 = arith.addf %8, %2 : vector<16x128xf32>
    %c0_8 = arith.constant 0 : index
    %c0_9 = arith.constant 0 : index
    %c0_10 = arith.constant 0 : index
    %10 = vector.load %arg5[%c0_8, %c0_9, %c0_10] : memref<2x16x128xf32, #tpu.memory_space<vmem>>, vector<1x16x128xf32>
    %11 = vector.shape_cast %10 : vector<1x16x128xf32> to vector<16x128xf32>
    %12 = vector.shape_cast %9 : vector<16x128xf32> to vector<1x16x128xf32>
    tpu.vector_store %arg5[%c0_8, %c0_9, %c0_10], %12 {strides = array<i32>} : memref<2x16x128xf32, #tpu.memory_space<vmem>>, vector<1x16x128xf32>,
    %c1 = arith.constant 1 : index
    %c0_11 = arith.constant 0 : index
    %c0_12 = arith.constant 0 : index
    %13 = vector.load %arg1[%c1, %c0_11, %c0_12] : memref<2x16x48xf32, #tpu.memory_space<vmem>>, vector<1x16x48xf32>
    %14 = vector.shape_cast %13 : vector<1x16x48xf32> to vector<16x48xf32>
    %15 = arith.truncf %14 : vector<16x48xf32> to vector<16x48xbf16>
    %cst_13 = arith.constant dense<0.000000e+00> : vector<16x128xf32>
    %16 = tpu.matmul %15, %0, %cst_13 {dimension_numbers = #tpu.dot_dimension_numbers<[1], [0], [0], [1], [0, 0, 1, 1], [], []>} : vector<16x48xbf16>, vector<48x128xbf16>, vector<16x128xf32> -> vector<16x128xf32>
    %17 = vector.broadcast %1 : vector<1x128xf32> to vector<16x128xf32>
    %18 = arith.addf %16, %17 : vector<16x128xf32>
    %19 = arith.addf %18, %2 : vector<16x128xf32>
    %c1_14 = arith.constant 1 : index
    %c0_15 = arith.constant 0 : index
    %c0_16 = arith.constant 0 : index
    %20 = vector.load %arg5[%c1_14, %c0_15, %c0_16] : memref<2x16x128xf32, #tpu.memory_space<vmem>>, vector<1x16x128xf32>
    %21 = vector.shape_cast %20 : vector<1x16x128xf32> to vector<16x128xf32>
    %22 = vector.shape_cast %19 : vector<16x128xf32> to vector<1x16x128xf32>
    tpu.vector_store %arg5[%c1_14, %c0_15, %c0_16], %22 {strides = array<i32>} : memref<2x16x128xf32, #tpu.memory_space<vmem>>, vector<1x16x128xf32>,
    return
  }
  func.func @transform_0(%arg0: i32) -> (i32, i32, i32) {
    %c0_i32 = arith.constant 0 : i32
    %c0_i32_0 = arith.constant 0 : i32
    %c0_i32_1 = arith.constant 0 : i32
    return %c0_i32, %arg0, %c0_i32_0 : i32, i32, i32
  }
  func.func @transform_1(%arg0: i32) -> (i32, i32) {
    %c0_i32 = arith.constant 0 : i32
    %c0_i32_0 = arith.constant 0 : i32
    %c0_i32_1 = arith.constant 0 : i32
    return %c0_i32, %c0_i32_0 : i32, i32
  }
  func.func @transform_2(%arg0: i32) -> (i32, i32) {
    %c0_i32 = arith.constant 0 : i32
    %c0_i32_0 = arith.constant 0 : i32
    %c0_i32_1 = arith.constant 0 : i32
    return %c0_i32, %c0_i32_0 : i32, i32
  }
  func.func @transform_3(%arg0: i32) -> (i32, i32) {
    %c0_i32 = arith.constant 0 : i32
    %c0_i32_0 = arith.constant 0 : i32
    return %arg0, %c0_i32 : i32, i32
  }
  func.func @transform_4(%arg0: i32) -> (i32, i32, i32) {
    %c0_i32 = arith.constant 0 : i32
    %c0_i32_0 = arith.constant 0 : i32
    %c0_i32_1 = arith.constant 0 : i32
    return %c0_i32, %arg0, %c0_i32_0 : i32, i32, i32
  }
}

</mosaic_0001>

<bundles_post_ra>
// kernel: tpu_custom_call.1
= control target key start
LH: loop header
LB: loop body
LE: loop exit
PB: predicated region body
PF: predicated region fallthrough
CT: control target
= control target key end

     0   :  { %9 = vsyncpa [#allocation3], 0  ;;  %s352_s0 = inlined_call_operand.hbm [shape: f32[2,16,48], index: 0, kind: input, shape index: {}]   ;;  %s353_s1 = inlined_call_operand.hbm [shape: bf16[48,128], index: 1, kind: input, shape index: {}]   ;;  %s354_s2 = inlined_call_operand.vmem [shape: f32[1,128], index: 2, kind: input, shape index: {}]   ;;  %s355_s3 = inlined_call_operand.hbm [shape: f32[16,128], index: 3, kind: input, shape index: {}]   ;;  %s356_s4 = inlined_call_operand.hbm [shape: f32[2,16,128], index: 4, kind: output, shape index: {}]  }
   0x1   :  { %10 = vsyncpa [#allocation6], 0  ;;  %s29_s17 = sshll.u32 %s353_s1, 4  ;;  %s30_s17 = int_to_ptr.hbm [resolvable:$true] %s29_s17 }
   0x2   :  { %11 = vsyncpa [#allocation4], 0  ;;  %s295_s18 = smov [#allocation5]   ;;  %s16_s22 = sshll.u32 %s352_s0, 4  ;;  %s17_s22 = int_to_ptr.hbm [resolvable:$true] %s16_s22 }
   0x3   :  { %s31_s19 = sshll.u32 %s295_s18, 4  ;;  %s296_s23 = smov 64   ;;  %s32_s19 = int_to_ptr.vmem [resolvable:$true] %s31_s19 }
   0x4   :  { %s297_s24 = smov 4   ;;  %s298_s25 = smov [#allocation2]  }
   0x5   :  { %37 = dma.hbm_to_vmem [thread:$0]  %s30_s17, 384, %s32_s19, [#allocation6], %s296_s23, %s296_s23, %s297_s24  }
   0x6   :  { %s18_s26 = sshll.u32 %s298_s25, 4  ;;  %s299_s27 = smov 128   ;;  %s19_s26 = int_to_ptr.vmem [resolvable:$true] %s18_s26 }
   0x7   :  { %s300_s28 = smov 8   ;;  %s44_s30 = sshll.u32 %s355_s3, 4  ;;  %s45_s30 = int_to_ptr.hbm [resolvable:$true] %s44_s30 }
   0x8   :  { %24 = dma.hbm_to_vmem [thread:$0]  %s17_s22, 512, %s19_s26, [#allocation3], %s299_s27, %s299_s27, %s300_s28  }
   0x9   :  { %s301_s5 = smov [#allocation7]  }
   0xa   :  { %s46_s0 = sshll.u32 %s301_s5, 4  ;;  %s47_s0 = int_to_ptr.vmem [resolvable:$true] %s46_s0 }
   0xb   :  { %52 = dma.hbm_to_vmem [thread:$0]  %s45_s30, 256, %s47_s0, [#allocation6], %s299_s27, %s299_s27, %s300_s28  }
   0xc   :  { %289 = dma.done.wait [#allocation3], 512  }
   0xd   :  { %290 = vsyncadd [#allocation3], 4294966784 }
   0xe   :  { %291 = dma.done.wait [#allocation6], 640  }
   0xf   :  { %292 = vsyncadd [#allocation6], 4294966656  ;;  %v183_v0 = vld [vmem:[#allocation5 + $0x10] sm:$0xff]  ;;  %v182_v1 = vld [vmem:[#allocation5 + $0x8] sm:$0xff]  ;;  %vm99_vm0 = vcmask 392192   ;;  %s302_s7 = smov [#allocation8]  }
  0x10   :  { %108 = vmatpush.bf16.msra.mxu0 %v183_v0  ;;  %133 = vmatpush.bf16.msra.mxu1 %v183_v0  ;;  %v181_v2 = vld [vmem:[#allocation5] sm:$0xff]  ;;  %v76_v4 = vld [vmem:[#allocation2 + $0x8] sm:$0xff]  ;;  %v122_v5 = vld [vmem:[#allocation2 + $0x10] sm:$0xff]  ;;  %s151_s8 = sshll.u32 %s302_s7, 4  ;;  %s152_s8 = int_to_ptr.vmem [resolvable:$true] %s151_s8 }
  0x11   :  { %v75_v3 = vld [vmem:[#allocation2] sm:$0xff]  ;;  %v123_v6 = vld [vmem:[#allocation2 + $0x18] sm:$0xff] }
  0x12   :  { %v77_v7 = vpack.c.bf16 %v76_v4, %v75_v3  ;;  %v124_v8 = vpack.c.bf16 %v123_v6, %v122_v5  ;;  %v192_v9 = vld [vmem:[%s354_s2] ss:$0 sm:$0xff]  ;;  %v73_v10 = vld [vmem:[#allocation7] sm:$0xff]  ;;  %s153_s2 = sshll.u32 %s356_s4, 4  ;;  %s154_s2 = int_to_ptr.hbm [resolvable:$true] %s153_s2 }
  0x13   :  { %v74_v17 = vld [vmem:[#allocation7 + $0x8] sm:$0xff] }
  0x14   :  { %109 = vmatpush.bf16.msra.mxu0 %v182_v1  ;;  %134 = vmatpush.bf16.msra.mxu1 %v182_v1 }
  0x18   :  { %110 = vmatpush.bf16.msra.mxu0 %v181_v2  ;;  %135 = vmatpush.bf16.msra.mxu1 %v181_v2 }
  0x1b   :  { %179 = vmatmul.msk.bf16.vlgmr.msra.gmra.mxu0 %vm99_vm0, %v77_v7  ;;  %180 = vmatmul.msk.bf16.vlgmr.msra.gmra.mxu1 %vm99_vm0, %v124_v8 }
  0x98   :  { %v112_v11 = vpop.f32.mrf.mxu0  ;;  %v137_v12 = vpop.f32.mrf.mxu1 }
  0x99   :  { %v113_v13 = vadd.f32 %v192_v9, %v112_v11  ;;  %v138_v14 = vadd.f32 %v192_v9, %v137_v12 }
  0x9b   :  { %v117_v15 = vadd.f32 %v113_v13, %v73_v10  ;;  %v142_v16 = vadd.f32 %v138_v14, %v73_v10 }
  0x9d   :  { %119 = vst [vmem:[#allocation8] sm:$0xff] %v117_v15 }
  0x9e   :  { %145 = vst [vmem:[#allocation8 + $0x10] sm:$0xff] %v142_v16 }
  0xa0   :  { %v114_v18 = vpop.f32.mrf.mxu0  ;;  %v139_v19 = vpop.f32.mrf.mxu1 }
  0xa1   :  { %v115_v20 = vadd.f32 %v192_v9, %v114_v18  ;;  %v140_v21 = vadd.f32 %v192_v9, %v139_v19 }
  0xa3   :  { %v118_v22 = vadd.f32 %v115_v20, %v74_v17  ;;  %v143_v23 = vadd.f32 %v140_v21, %v74_v17 }
  0xa5   :  { %120 = vst [vmem:[#allocation8 + $0x8] sm:$0xff] %v118_v22 }
  0xa6   :  { %146 = vst [vmem:[#allocation8 + $0x18] sm:$0xff] %v143_v23 }
  0xa7   :  { %159 = dma.vmem_to_hbm [thread:$0]  %s152_s8, 512, %s154_s2, [#allocation4], %s299_s27, %s299_s27, %s300_s28  }
  0xa8   :  { %293 = dma.done.wait [#allocation4], 512  }
  0xa9   :  { %294 = vsyncadd [#allocation4], 4294966784 }
  0xaa   :  { %164 = vsyncpa [#allocation3], 1 }
  0xab   :  { %165 = vsyncpa [#allocation6], 1 }
  0xac   :  { %166 = vsyncpa [#allocation4], 1 }

</bundles_post_ra>
